<compile_context>
chip_gen: v6e
topology: v6e:2x2x1
jax: 0.10.0
libtpu: 0.0.40
codegen_flags: <defaults>
</compile_context>

<pallas_src>
import functools

import jax
import jax.numpy as jnp
from jax import lax
from jax.experimental import pallas as pl
from jax.experimental.pallas import tpu as pltpu

LANES = 128                 # lane-dense width for every padded block / output
HIDDEN = 24                 # fc1/fc2 hidden size (fixed by the PyTorch module)
MXU_BATCH_THRESHOLD = 128   # below this, do all contractions on the VPU

# ---- packed-weight slab layout (row offsets are multiples of 8) ------------
_W1_ROW = 0      # rows [  0,   8): w1 rows (num_feats <= 8), cols [0, 24)
_BIAS_ROW = 8    # rows [  8,  16): row 8 = b1, row 9 = b2, row 10 = b3|b4
_W2_ROW = 16     # rows [ 16, 144): w2 padded to (128, 128), valid [0:24, 0:24)
_W34_ROW = 144   # rows [144, 272): w3|w4 padded to (128, 128), valid [0:24, 0:A+1)
_SLAB_ROWS = 272                       # (272, 128) f32 = ~139 KiB in VMEM


def net_kernel(x_ref, slab_ref, out_ref, *, num_actions, num_feats, use_mxu):
    x = x_ref[...]                                        # (B, F)
    batch = x_ref.shape[0]

    b1 = slab_ref[_BIAS_ROW + 0:_BIAS_ROW + 1, :]         # (1, 128), pad lanes 0
    b2 = slab_ref[_BIAS_ROW + 1:_BIAS_ROW + 2, :]         # (1, 128), pad lanes 0
    b34 = slab_ref[_BIAS_ROW + 2:_BIAS_ROW + 3, :]        # (1, 128)  (b3 | b4 | 0)

    # ---- fc1: K = num_feats (=2) is far too small for the MXU -> unrolled
    # broadcast-FMAs on the VPU.  Weight/bias pad lanes are zero, so the
    # (B, 128) activation is exactly zero in lanes [HIDDEN, 128).
    h1 = b1
    for f in range(num_feats):
        h1 = h1 + x[:, f:f + 1] * slab_ref[_W1_ROW + f:_W1_ROW + f + 1, :]
    h1 = jnp.maximum(h1, 0.0)                             # (B, 128)

    if use_mxu:
        # Large batch: lane-padded (128,128) weight blocks -> no masked slices,
        # two MXU trips with f32 accumulation.
        w2 = slab_ref[_W2_ROW:_W2_ROW + LANES, :]         # (128, 128)
        h2 = jnp.dot(h1, w2, preferred_element_type=jnp.float32) + b2
        h2 = jnp.maximum(h2, 0.0)                         # (B, 128), pad lanes 0
        w34 = slab_ref[_W34_ROW:_W34_ROW + LANES, :]      # (128, 128)
        y = jnp.dot(h2, w34, preferred_element_type=jnp.float32) + b34
    else:
        # Small batch: MXU fill/drain + result-FIFO latency dominates, so keep
        # fc2 and the fused adv|val head on the VPU as unrolled FMAs too.
        h2 = b2
        for j in range(HIDDEN):
            h2 = h2 + h1[:, j:j + 1] * slab_ref[_W2_ROW + j:_W2_ROW + j + 1, :]
        h2 = jnp.maximum(h2, 0.0)                         # (B, 128), pad lanes 0
        y = b34
        for j in range(HIDDEN):
            y = y + h2[:, j:j + 1] * slab_ref[_W34_ROW + j:_W34_ROW + j + 1, :]

    # y[:, :A] = adv, y[:, A] = val, lanes [A+1, 128) are exactly zero.

    # ---- global adv mean via a full-width masked sum (no sub-tile slice).
    lane_ids = lax.broadcasted_iota(jnp.int32, (1, LANES), 1)
    adv_mask = lane_ids < num_actions                     # (1, 128) constant mask
    adv_sum = jnp.sum(jnp.where(adv_mask, y, 0.0))
    mean_adv = adv_sum * (1.0 / float(batch * num_actions))

    # ---- dueling combine: fold the scalar mean into the value column; one
    # lane-broadcast add gives the lane-dense output slab.  Pad lanes are
    # forced to zero so the slab can be consumed directly downstream.
    val = y[:, num_actions:num_actions + 1]               # (B, 1)
    out = y + (val - mean_adv)
    out_ref[...] = jnp.where(adv_mask, out, 0.0)


def make_params(key, num_feats, num_actions, hidden=HIDDEN, dtype=jnp.float32):
    """PyTorch-style init: U(-1/sqrt(fan_in), 1/sqrt(fan_in)).
    Weights stored as (in_features, out_features); biases as (1, out)."""
    dims = [(num_feats, hidden), (hidden, hidden),
            (hidden, num_actions), (hidden, 1)]
    params = []
    for fan_in, fan_out in dims:
        key, kw, kb = jax.random.split(key, 3)
        bound = 1.0 / jnp.sqrt(jnp.asarray(fan_in, dtype))
        w = jax.random.uniform(kw, (fan_in, fan_out), dtype, -bound, bound)
        b = jax.random.uniform(kb, (1, fan_out), dtype, -bound, bound)
        params += [w, b]
    return params


def pack_params(w1, b1, w2, b2, w3, b3, w4, b4):
    """One-time packing of all constants into a single 8-row-aligned f32 slab
    -> exactly one weight DMA per kernel call."""
    cast = lambda a: jnp.asarray(a, jnp.float32)
    w1, b1, w2, b2, w3, b3, w4, b4 = map(cast, (w1, b1, w2, b2, w3, b3, w4, b4))

    num_feats, hidden = w1.shape
    num_actions = w3.shape[1]
    assert hidden == HIDDEN, "slab layout assumes hidden == 24"
    assert num_feats <= 8, "w1 block holds at most 8 input features"
    assert num_actions + 1 <= LANES

    slab = jnp.zeros((_SLAB_ROWS, LANES), jnp.float32)
    slab = slab.at[_W1_ROW:_W1_ROW + num_feats, :hidden].set(w1)
    slab = slab.at[_BIAS_ROW + 0, :hidden].set(b1.reshape(-1))
    slab = slab.at[_BIAS_ROW + 1, :hidden].set(b2.reshape(-1))
    slab = slab.at[_BIAS_ROW + 2, :num_actions].set(b3.reshape(-1))
    slab = slab.at[_BIAS_ROW + 2, num_actions].set(b4.reshape(-1)[0])
    slab = slab.at[_W2_ROW:_W2_ROW + hidden, :hidden].set(w2)
    slab = slab.at[_W34_ROW:_W34_ROW + hidden, :num_actions].set(w3)
    slab = slab.at[_W34_ROW:_W34_ROW + hidden, num_actions].set(w4[:, 0])
    return slab


@functools.partial(jax.jit, static_argnames=("num_actions",))
def net_forward_padded(x, slab, *, num_actions):
    """Lane-dense (B, 128) output: cols [:A] hold Q-values, pad lanes are zero.
    Preferred entry point if the consumer (argmax / TD-max) is fused next."""
    batch, num_feats = x.shape
    use_mxu = batch >= MXU_BATCH_THRESHOLD   # static at trace time

    vmem = pl.BlockSpec(memory_space=pltpu.MemorySpace.VMEM)
    flops = 2 * batch * (num_feats * HIDDEN + HIDDEN * HIDDEN
                         + HIDDEN * (num_actions + 1))
    bytes_accessed = 4 * (x.size + slab.size + batch * LANES)

    return pl.pallas_call(
        functools.partial(net_kernel, num_actions=num_actions,
                          num_feats=num_feats, use_mxu=use_mxu),
        out_shape=jax.ShapeDtypeStruct((batch, LANES), jnp.float32),
        in_specs=[vmem, vmem],
        out_specs=vmem,
        cost_estimate=pl.CostEstimate(flops=flops, transcendentals=0,
                                      bytes_accessed=bytes_accessed),
    )(x, slab)


@functools.partial(jax.jit, static_argnames=("num_actions",))
def net_forward(x, slab, *, num_actions):
    """Module-equivalent (B, num_actions) output.  The slice is the one extra
    XLA op; fuse the downstream consumer onto net_forward_padded to avoid it."""
    return net_forward_padded(x, slab, num_actions=num_actions)[:, :num_actions]


def reference_forward(x, w1, b1, w2, b2, w3, b3, w4, b4):
    h1 = jnp.maximum(x @ w1 + b1, 0.0)
    h2 = jnp.maximum(h1 @ w2 + b2, 0.0)
    adv = h2 @ w3 + b3
    val = h2 @ w4 + b4
    return val + adv - jnp.mean(adv)


if __name__ == "__main__":
    # MountainCar-like sizes: 2 state features, 3 actions.
    batch, num_feats, num_actions = 8, 2, 3

    key = jax.random.PRNGKey(0)
    key, kx = jax.random.split(key)
    raw_params = make_params(key, num_feats, num_actions)
    slab = pack_params(*raw_params)

    # Small batch -> VPU-only path (no MXU round trips).
    x_small = jax.random.normal(kx, (batch, num_feats), jnp.float32)
    out_small = net_forward(x_small, slab, num_actions=num_actions)
    jax.block_until_ready(out_small)
    ref_small = reference_forward(x_small, *raw_params)
    assert out_small.shape == (batch, num_actions)
    assert jnp.allclose(out_small, ref_small, atol=1e-5, rtol=1e-5)

    # Pad lanes of the lane-dense slab are zeroed in-kernel (safe to consume).
    padded = net_forward_padded(x_small, slab, num_actions=num_actions)
    jax.block_until_ready(padded)
    assert jnp.allclose(padded[:, :num_actions], ref_small, atol=1e-5, rtol=1e-5)
    assert jnp.allclose(padded[:, num_actions:], 0.0)

    # Larger batch -> MXU path; also amortizes the fixed dispatch cost
    # (review point: call with replay/vector-env batches, not per-state).
    key, kx2 = jax.random.split(key)
    x_big = jax.random.normal(kx2, (256, num_feats), jnp.float32)
    out_big = net_forward(x_big, slab, num_actions=num_actions)
    jax.block_until_ready(out_big)
    ref_big = reference_forward(x_big, *raw_params)
    assert out_big.shape == (256, num_actions)
    assert jnp.allclose(out_big, ref_big, atol=1e-4, rtol=1e-4)

    print("KERNEL_OK")
</pallas_src>

<mosaic_0001>
module attributes {stable_mosaic.version = 11 : i64} {
  func.func @net_kernel(%arg0: memref<8x2xf32, #tpu.memory_space<vmem>>, %arg1: memref<272x128xf32, #tpu.memory_space<vmem>>, %arg2: memref<8x128xf32, #tpu.memory_space<vmem>>) attributes {dimension_semantics = [], scalar_prefetch = 0 : i64, scratch_operands = 0 : i64, tpu.core_type = #tpu.core_type<tc>} {
    %c0 = arith.constant 0 : index
    %c0_0 = arith.constant 0 : index
    %0 = vector.load %arg0[%c0, %c0_0] : memref<8x2xf32, #tpu.memory_space<vmem>>, vector<8x2xf32>
    %c8 = arith.constant 8 : index
    %c0_1 = arith.constant 0 : index
    %1 = vector.load %arg1[%c8, %c0_1] : memref<272x128xf32, #tpu.memory_space<vmem>>, vector<1x128xf32>
    %c9 = arith.constant 9 : index
    %c0_2 = arith.constant 0 : index
    %2 = vector.load %arg1[%c9, %c0_2] : memref<272x128xf32, #tpu.memory_space<vmem>>, vector<1x128xf32>
    %c10 = arith.constant 10 : index
    %c0_3 = arith.constant 0 : index
    %3 = vector.load %arg1[%c10, %c0_3] : memref<272x128xf32, #tpu.memory_space<vmem>>, vector<1x128xf32>
    %4 = vector.extract_strided_slice %0 {offsets = [0, 0], sizes = [8, 1], strides = [1, 1]} : vector<8x2xf32> to vector<8x1xf32>
    %c0_4 = arith.constant 0 : index
    %c0_5 = arith.constant 0 : index
    %5 = vector.load %arg1[%c0_4, %c0_5] : memref<272x128xf32, #tpu.memory_space<vmem>>, vector<1x128xf32>
    %6 = vector.broadcast %4 : vector<8x1xf32> to vector<8x128xf32>
    %7 = vector.broadcast %5 : vector<1x128xf32> to vector<8x128xf32>
    %8 = arith.mulf %6, %7 : vector<8x128xf32>
    %9 = vector.broadcast %1 : vector<1x128xf32> to vector<8x128xf32>
    %10 = arith.addf %9, %8 : vector<8x128xf32>
    %11 = vector.extract_strided_slice %0 {offsets = [0, 1], sizes = [8, 1], strides = [1, 1]} : vector<8x2xf32> to vector<8x1xf32>
    %c1 = arith.constant 1 : index
    %c0_6 = arith.constant 0 : index
    %12 = vector.load %arg1[%c1, %c0_6] : memref<272x128xf32, #tpu.memory_space<vmem>>, vector<1x128xf32>
    %13 = vector.broadcast %11 : vector<8x1xf32> to vector<8x128xf32>
    %14 = vector.broadcast %12 : vector<1x128xf32> to vector<8x128xf32>
    %15 = arith.mulf %13, %14 : vector<8x128xf32>
    %16 = arith.addf %10, %15 : vector<8x128xf32>
    %cst = arith.constant 0.000000e+00 : f32
    %17 = vector.broadcast %cst : f32 to vector<8x128xf32>
    %18 = arith.maximumf %16, %17 : vector<8x128xf32>
    %19 = vector.extract_strided_slice %18 {offsets = [0, 0], sizes = [8, 1], strides = [1, 1]} : vector<8x128xf32> to vector<8x1xf32>
    %c16 = arith.constant 16 : index
    %c0_7 = arith.constant 0 : index
    %20 = vector.load %arg1[%c16, %c0_7] : memref<272x128xf32, #tpu.memory_space<vmem>>, vector<1x128xf32>
    %21 = vector.broadcast %19 : vector<8x1xf32> to vector<8x128xf32>
    %22 = vector.broadcast %20 : vector<1x128xf32> to vector<8x128xf32>
    %23 = arith.mulf %21, %22 : vector<8x128xf32>
    %24 = vector.broadcast %2 : vector<1x128xf32> to vector<8x128xf32>
    %25 = arith.addf %24, %23 : vector<8x128xf32>
    %26 = vector.extract_strided_slice %18 {offsets = [0, 1], sizes = [8, 1], strides = [1, 1]} : vector<8x128xf32> to vector<8x1xf32>
    %c17 = arith.constant 17 : index
    %c0_8 = arith.constant 0 : index
    %27 = vector.load %arg1[%c17, %c0_8] : memref<272x128xf32, #tpu.memory_space<vmem>>, vector<1x128xf32>
    %28 = vector.broadcast %26 : vector<8x1xf32> to vector<8x128xf32>
    %29 = vector.broadcast %27 : vector<1x128xf32> to vector<8x128xf32>
    %30 = arith.mulf %28, %29 : vector<8x128xf32>
    %31 = arith.addf %25, %30 : vector<8x128xf32>
    %32 = vector.extract_strided_slice %18 {offsets = [0, 2], sizes = [8, 1], strides = [1, 1]} : vector<8x128xf32> to vector<8x1xf32>
    %c18 = arith.constant 18 : index
    %c0_9 = arith.constant 0 : index
    %33 = vector.load %arg1[%c18, %c0_9] : memref<272x128xf32, #tpu.memory_space<vmem>>, vector<1x128xf32>
    %34 = vector.broadcast %32 : vector<8x1xf32> to vector<8x128xf32>
    %35 = vector.broadcast %33 : vector<1x128xf32> to vector<8x128xf32>
    %36 = arith.mulf %34, %35 : vector<8x128xf32>
    %37 = arith.addf %31, %36 : vector<8x128xf32>
    %38 = vector.extract_strided_slice %18 {offsets = [0, 3], sizes = [8, 1], strides = [1, 1]} : vector<8x128xf32> to vector<8x1xf32>
    %c19 = arith.constant 19 : index
    %c0_10 = arith.constant 0 : index
    %39 = vector.load %arg1[%c19, %c0_10] : memref<272x128xf32, #tpu.memory_space<vmem>>, vector<1x128xf32>
    %40 = vector.broadcast %38 : vector<8x1xf32> to vector<8x128xf32>
    %41 = vector.broadcast %39 : vector<1x128xf32> to vector<8x128xf32>
    %42 = arith.mulf %40, %41 : vector<8x128xf32>
    %43 = arith.addf %37, %42 : vector<8x128xf32>
    %44 = vector.extract_strided_slice %18 {offsets = [0, 4], sizes = [8, 1], strides = [1, 1]} : vector<8x128xf32> to vector<8x1xf32>
    %c20 = arith.constant 20 : index
    %c0_11 = arith.constant 0 : index
    %45 = vector.load %arg1[%c20, %c0_11] : memref<272x128xf32, #tpu.memory_space<vmem>>, vector<1x128xf32>
    %46 = vector.broadcast %44 : vector<8x1xf32> to vector<8x128xf32>
    %47 = vector.broadcast %45 : vector<1x128xf32> to vector<8x128xf32>
    %48 = arith.mulf %46, %47 : vector<8x128xf32>
    %49 = arith.addf %43, %48 : vector<8x128xf32>
    %50 = vector.extract_strided_slice %18 {offsets = [0, 5], sizes = [8, 1], strides = [1, 1]} : vector<8x128xf32> to vector<8x1xf32>
    %c21 = arith.constant 21 : index
    %c0_12 = arith.constant 0 : index
    %51 = vector.load %arg1[%c21, %c0_12] : memref<272x128xf32, #tpu.memory_space<vmem>>, vector<1x128xf32>
    %52 = vector.broadcast %50 : vector<8x1xf32> to vector<8x128xf32>
    %53 = vector.broadcast %51 : vector<1x128xf32> to vector<8x128xf32>
    %54 = arith.mulf %52, %53 : vector<8x128xf32>
    %55 = arith.addf %49, %54 : vector<8x128xf32>
    %56 = vector.extract_strided_slice %18 {offsets = [0, 6], sizes = [8, 1], strides = [1, 1]} : vector<8x128xf32> to vector<8x1xf32>
    %c22 = arith.constant 22 : index
    %c0_13 = arith.constant 0 : index
    %57 = vector.load %arg1[%c22, %c0_13] : memref<272x128xf32, #tpu.memory_space<vmem>>, vector<1x128xf32>
    %58 = vector.broadcast %56 : vector<8x1xf32> to vector<8x128xf32>
    %59 = vector.broadcast %57 : vector<1x128xf32> to vector<8x128xf32>
    %60 = arith.mulf %58, %59 : vector<8x128xf32>
    %61 = arith.addf %55, %60 : vector<8x128xf32>
    %62 = vector.extract_strided_slice %18 {offsets = [0, 7], sizes = [8, 1], strides = [1, 1]} : vector<8x128xf32> to vector<8x1xf32>
    %c23 = arith.constant 23 : index
    %c0_14 = arith.constant 0 : index
    %63 = vector.load %arg1[%c23, %c0_14] : memref<272x128xf32, #tpu.memory_space<vmem>>, vector<1x128xf32>
    %64 = vector.broadcast %62 : vector<8x1xf32> to vector<8x128xf32>
    %65 = vector.broadcast %63 : vector<1x128xf32> to vector<8x128xf32>
    %66 = arith.mulf %64, %65 : vector<8x128xf32>
    %67 = arith.addf %61, %66 : vector<8x128xf32>
    %68 = vector.extract_strided_slice %18 {offsets = [0, 8], sizes = [8, 1], strides = [1, 1]} : vector<8x128xf32> to vector<8x1xf32>
    %c24 = arith.constant 24 : index
    %c0_15 = arith.constant 0 : index
    %69 = vector.load %arg1[%c24, %c0_15] : memref<272x128xf32, #tpu.memory_space<vmem>>, vector<1x128xf32>
    %70 = vector.broadcast %68 : vector<8x1xf32> to vector<8x128xf32>
    %71 = vector.broadcast %69 : vector<1x128xf32> to vector<8x128xf32>
    %72 = arith.mulf %70, %71 : vector<8x128xf32>
    %73 = arith.addf %67, %72 : vector<8x128xf32>
    %74 = vector.extract_strided_slice %18 {offsets = [0, 9], sizes = [8, 1], strides = [1, 1]} : vector<8x128xf32> to vector<8x1xf32>
    %c25 = arith.constant 25 : index
    %c0_16 = arith.constant 0 : index
    %75 = vector.load %arg1[%c25, %c0_16] : memref<272x128xf32, #tpu.memory_space<vmem>>, vector<1x128xf32>
    %76 = vector.broadcast %74 : vector<8x1xf32> to vector<8x128xf32>
    %77 = vector.broadcast %75 : vector<1x128xf32> to vector<8x128xf32>
    %78 = arith.mulf %76, %77 : vector<8x128xf32>
    %79 = arith.addf %73, %78 : vector<8x128xf32>
    %80 = vector.extract_strided_slice %18 {offsets = [0, 10], sizes = [8, 1], strides = [1, 1]} : vector<8x128xf32> to vector<8x1xf32>
    %c26 = arith.constant 26 : index
    %c0_17 = arith.constant 0 : index
    %81 = vector.load %arg1[%c26, %c0_17] : memref<272x128xf32, #tpu.memory_space<vmem>>, vector<1x128xf32>
    %82 = vector.broadcast %80 : vector<8x1xf32> to vector<8x128xf32>
    %83 = vector.broadcast %81 : vector<1x128xf32> to vector<8x128xf32>
    %84 = arith.mulf %82, %83 : vector<8x128xf32>
    %85 = arith.addf %79, %84 : vector<8x128xf32>
    %86 = vector.extract_strided_slice %18 {offsets = [0, 11], sizes = [8, 1], strides = [1, 1]} : vector<8x128xf32> to vector<8x1xf32>
    %c27 = arith.constant 27 : index
    %c0_18 = arith.constant 0 : index
    %87 = vector.load %arg1[%c27, %c0_18] : memref<272x128xf32, #tpu.memory_space<vmem>>, vector<1x128xf32>
    %88 = vector.broadcast %86 : vector<8x1xf32> to vector<8x128xf32>
    %89 = vector.broadcast %87 : vector<1x128xf32> to vector<8x128xf32>
    %90 = arith.mulf %88, %89 : vector<8x128xf32>
    %91 = arith.addf %85, %90 : vector<8x128xf32>
    %92 = vector.extract_strided_slice %18 {offsets = [0, 12], sizes = [8, 1], strides = [1, 1]} : vector<8x128xf32> to vector<8x1xf32>
    %c28 = arith.constant 28 : index
    %c0_19 = arith.constant 0 : index
    %93 = vector.load %arg1[%c28, %c0_19] : memref<272x128xf32, #tpu.memory_space<vmem>>, vector<1x128xf32>
    %94 = vector.broadcast %92 : vector<8x1xf32> to vector<8x128xf32>
    %95 = vector.broadcast %93 : vector<1x128xf32> to vector<8x128xf32>
    %96 = arith.mulf %94, %95 : vector<8x128xf32>
    %97 = arith.addf %91, %96 : vector<8x128xf32>
    %98 = vector.extract_strided_slice %18 {offsets = [0, 13], sizes = [8, 1], strides = [1, 1]} : vector<8x128xf32> to vector<8x1xf32>
    %c29 = arith.constant 29 : index
    %c0_20 = arith.constant 0 : index
    %99 = vector.load %arg1[%c29, %c0_20] : memref<272x128xf32, #tpu.memory_space<vmem>>, vector<1x128xf32>
    %100 = vector.broadcast %98 : vector<8x1xf32> to vector<8x128xf32>
    %101 = vector.broadcast %99 : vector<1x128xf32> to vector<8x128xf32>
    %102 = arith.mulf %100, %101 : vector<8x128xf32>
    %103 = arith.addf %97, %102 : vector<8x128xf32>
    %104 = vector.extract_strided_slice %18 {offsets = [0, 14], sizes = [8, 1], strides = [1, 1]} : vector<8x128xf32> to vector<8x1xf32>
    %c30 = arith.constant 30 : index
    %c0_21 = arith.constant 0 : index
    %105 = vector.load %arg1[%c30, %c0_21] : memref<272x128xf32, #tpu.memory_space<vmem>>, vector<1x128xf32>
    %106 = vector.broadcast %104 : vector<8x1xf32> to vector<8x128xf32>
    %107 = vector.broadcast %105 : vector<1x128xf32> to vector<8x128xf32>
    %108 = arith.mulf %106, %107 : vector<8x128xf32>
    %109 = arith.addf %103, %108 : vector<8x128xf32>
    %110 = vector.extract_strided_slice %18 {offsets = [0, 15], sizes = [8, 1], strides = [1, 1]} : vector<8x128xf32> to vector<8x1xf32>
    %c31 = arith.constant 31 : index
    %c0_22 = arith.constant 0 : index
    %111 = vector.load %arg1[%c31, %c0_22] : memref<272x128xf32, #tpu.memory_space<vmem>>, vector<1x128xf32>
    %112 = vector.broadcast %110 : vector<8x1xf32> to vector<8x128xf32>
    %113 = vector.broadcast %111 : vector<1x128xf32> to vector<8x128xf32>
    %114 = arith.mulf %112, %113 : vector<8x128xf32>
    %115 = arith.addf %109, %114 : vector<8x128xf32>
    %116 = vector.extract_strided_slice %18 {offsets = [0, 16], sizes = [8, 1], strides = [1, 1]} : vector<8x128xf32> to vector<8x1xf32>
    %c32 = arith.constant 32 : index
    %c0_23 = arith.constant 0 : index
    %117 = vector.load %arg1[%c32, %c0_23] : memref<272x128xf32, #tpu.memory_space<vmem>>, vector<1x128xf32>
    %118 = vector.broadcast %116 : vector<8x1xf32> to vector<8x128xf32>
    %119 = vector.broadcast %117 : vector<1x128xf32> to vector<8x128xf32>
    %120 = arith.mulf %118, %119 : vector<8x128xf32>
    %121 = arith.addf %115, %120 : vector<8x128xf32>
    %122 = vector.extract_strided_slice %18 {offsets = [0, 17], sizes = [8, 1], strides = [1, 1]} : vector<8x128xf32> to vector<8x1xf32>
    %c33 = arith.constant 33 : index
    %c0_24 = arith.constant 0 : index
    %123 = vector.load %arg1[%c33, %c0_24] : memref<272x128xf32, #tpu.memory_space<vmem>>, vector<1x128xf32>
    %124 = vector.broadcast %122 : vector<8x1xf32> to vector<8x128xf32>
    %125 = vector.broadcast %123 : vector<1x128xf32> to vector<8x128xf32>
    %126 = arith.mulf %124, %125 : vector<8x128xf32>
    %127 = arith.addf %121, %126 : vector<8x128xf32>
    %128 = vector.extract_strided_slice %18 {offsets = [0, 18], sizes = [8, 1], strides = [1, 1]} : vector<8x128xf32> to vector<8x1xf32>
    %c34 = arith.constant 34 : index
    %c0_25 = arith.constant 0 : index
    %129 = vector.load %arg1[%c34, %c0_25] : memref<272x128xf32, #tpu.memory_space<vmem>>, vector<1x128xf32>
    %130 = vector.broadcast %128 : vector<8x1xf32> to vector<8x128xf32>
    %131 = vector.broadcast %129 : vector<1x128xf32> to vector<8x128xf32>
    %132 = arith.mulf %130, %131 : vector<8x128xf32>
    %133 = arith.addf %127, %132 : vector<8x128xf32>
    %134 = vector.extract_strided_slice %18 {offsets = [0, 19], sizes = [8, 1], strides = [1, 1]} : vector<8x128xf32> to vector<8x1xf32>
    %c35 = arith.constant 35 : index
    %c0_26 = arith.constant 0 : index
    %135 = vector.load %arg1[%c35, %c0_26] : memref<272x128xf32, #tpu.memory_space<vmem>>, vector<1x128xf32>
    %136 = vector.broadcast %134 : vector<8x1xf32> to vector<8x128xf32>
    %137 = vector.broadcast %135 : vector<1x128xf32> to vector<8x128xf32>
    %138 = arith.mulf %136, %137 : vector<8x128xf32>
    %139 = arith.addf %133, %138 : vector<8x128xf32>
    %140 = vector.extract_strided_slice %18 {offsets = [0, 20], sizes = [8, 1], strides = [1, 1]} : vector<8x128xf32> to vector<8x1xf32>
    %c36 = arith.constant 36 : index
    %c0_27 = arith.constant 0 : index
    %141 = vector.load %arg1[%c36, %c0_27] : memref<272x128xf32, #tpu.memory_space<vmem>>, vector<1x128xf32>
    %142 = vector.broadcast %140 : vector<8x1xf32> to vector<8x128xf32>
    %143 = vector.broadcast %141 : vector<1x128xf32> to vector<8x128xf32>
    %144 = arith.mulf %142, %143 : vector<8x128xf32>
    %145 = arith.addf %139, %144 : vector<8x128xf32>
    %146 = vector.extract_strided_slice %18 {offsets = [0, 21], sizes = [8, 1], strides = [1, 1]} : vector<8x128xf32> to vector<8x1xf32>
    %c37 = arith.constant 37 : index
    %c0_28 = arith.constant 0 : index
    %147 = vector.load %arg1[%c37, %c0_28] : memref<272x128xf32, #tpu.memory_space<vmem>>, vector<1x128xf32>
    %148 = vector.broadcast %146 : vector<8x1xf32> to vector<8x128xf32>
    %149 = vector.broadcast %147 : vector<1x128xf32> to vector<8x128xf32>
    %150 = arith.mulf %148, %149 : vector<8x128xf32>
    %151 = arith.addf %145, %150 : vector<8x128xf32>
    %152 = vector.extract_strided_slice %18 {offsets = [0, 22], sizes = [8, 1], strides = [1, 1]} : vector<8x128xf32> to vector<8x1xf32>
    %c38 = arith.constant 38 : index
    %c0_29 = arith.constant 0 : index
    %153 = vector.load %arg1[%c38, %c0_29] : memref<272x128xf32, #tpu.memory_space<vmem>>, vector<1x128xf32>
    %154 = vector.broadcast %152 : vector<8x1xf32> to vector<8x128xf32>
    %155 = vector.broadcast %153 : vector<1x128xf32> to vector<8x128xf32>
    %156 = arith.mulf %154, %155 : vector<8x128xf32>
    %157 = arith.addf %151, %156 : vector<8x128xf32>
    %158 = vector.extract_strided_slice %18 {offsets = [0, 23], sizes = [8, 1], strides = [1, 1]} : vector<8x128xf32> to vector<8x1xf32>
    %c39 = arith.constant 39 : index
    %c0_30 = arith.constant 0 : index
    %159 = vector.load %arg1[%c39, %c0_30] : memref<272x128xf32, #tpu.memory_space<vmem>>, vector<1x128xf32>
    %160 = vector.broadcast %158 : vector<8x1xf32> to vector<8x128xf32>
    %161 = vector.broadcast %159 : vector<1x128xf32> to vector<8x128xf32>
    %162 = arith.mulf %160, %161 : vector<8x128xf32>
    %163 = arith.addf %157, %162 : vector<8x128xf32>
    %cst_31 = arith.constant 0.000000e+00 : f32
    %164 = vector.broadcast %cst_31 : f32 to vector<8x128xf32>
    %165 = arith.maximumf %163, %164 : vector<8x128xf32>
    %166 = vector.extract_strided_slice %165 {offsets = [0, 0], sizes = [8, 1], strides = [1, 1]} : vector<8x128xf32> to vector<8x1xf32>
    %c144 = arith.constant 144 : index
    %c0_32 = arith.constant 0 : index
    %167 = vector.load %arg1[%c144, %c0_32] : memref<272x128xf32, #tpu.memory_space<vmem>>, vector<1x128xf32>
    %168 = vector.broadcast %166 : vector<8x1xf32> to vector<8x128xf32>
    %169 = vector.broadcast %167 : vector<1x128xf32> to vector<8x128xf32>
    %170 = arith.mulf %168, %169 : vector<8x128xf32>
    %171 = vector.broadcast %3 : vector<1x128xf32> to vector<8x128xf32>
    %172 = arith.addf %171, %170 : vector<8x128xf32>
    %173 = vector.extract_strided_slice %165 {offsets = [0, 1], sizes = [8, 1], strides = [1, 1]} : vector<8x128xf32> to vector<8x1xf32>
    %c145 = arith.constant 145 : index
    %c0_33 = arith.constant 0 : index
    %174 = vector.load %arg1[%c145, %c0_33] : memref<272x128xf32, #tpu.memory_space<vmem>>, vector<1x128xf32>
    %175 = vector.broadcast %173 : vector<8x1xf32> to vector<8x128xf32>
    %176 = vector.broadcast %174 : vector<1x128xf32> to vector<8x128xf32>
    %177 = arith.mulf %175, %176 : vector<8x128xf32>
    %178 = arith.addf %172, %177 : vector<8x128xf32>
    %179 = vector.extract_strided_slice %165 {offsets = [0, 2], sizes = [8, 1], strides = [1, 1]} : vector<8x128xf32> to vector<8x1xf32>
    %c146 = arith.constant 146 : index
    %c0_34 = arith.constant 0 : index
    %180 = vector.load %arg1[%c146, %c0_34] : memref<272x128xf32, #tpu.memory_space<vmem>>, vector<1x128xf32>
    %181 = vector.broadcast %179 : vector<8x1xf32> to vector<8x128xf32>
    %182 = vector.broadcast %180 : vector<1x128xf32> to vector<8x128xf32>
    %183 = arith.mulf %181, %182 : vector<8x128xf32>
    %184 = arith.addf %178, %183 : vector<8x128xf32>
    %185 = vector.extract_strided_slice %165 {offsets = [0, 3], sizes = [8, 1], strides = [1, 1]} : vector<8x128xf32> to vector<8x1xf32>
    %c147 = arith.constant 147 : index
    %c0_35 = arith.constant 0 : index
    %186 = vector.load %arg1[%c147, %c0_35] : memref<272x128xf32, #tpu.memory_space<vmem>>, vector<1x128xf32>
    %187 = vector.broadcast %185 : vector<8x1xf32> to vector<8x128xf32>
    %188 = vector.broadcast %186 : vector<1x128xf32> to vector<8x128xf32>
    %189 = arith.mulf %187, %188 : vector<8x128xf32>
    %190 = arith.addf %184, %189 : vector<8x128xf32>
    %191 = vector.extract_strided_slice %165 {offsets = [0, 4], sizes = [8, 1], strides = [1, 1]} : vector<8x128xf32> to vector<8x1xf32>
    %c148 = arith.constant 148 : index
    %c0_36 = arith.constant 0 : index
    %192 = vector.load %arg1[%c148, %c0_36] : memref<272x128xf32, #tpu.memory_space<vmem>>, vector<1x128xf32>
    %193 = vector.broadcast %191 : vector<8x1xf32> to vector<8x128xf32>
    %194 = vector.broadcast %192 : vector<1x128xf32> to vector<8x128xf32>
    %195 = arith.mulf %193, %194 : vector<8x128xf32>
    %196 = arith.addf %190, %195 : vector<8x128xf32>
    %197 = vector.extract_strided_slice %165 {offsets = [0, 5], sizes = [8, 1], strides = [1, 1]} : vector<8x128xf32> to vector<8x1xf32>
    %c149 = arith.constant 149 : index
    %c0_37 = arith.constant 0 : index
    %198 = vector.load %arg1[%c149, %c0_37] : memref<272x128xf32, #tpu.memory_space<vmem>>, vector<1x128xf32>
    %199 = vector.broadcast %197 : vector<8x1xf32> to vector<8x128xf32>
    %200 = vector.broadcast %198 : vector<1x128xf32> to vector<8x128xf32>
    %201 = arith.mulf %199, %200 : vector<8x128xf32>
    %202 = arith.addf %196, %201 : vector<8x128xf32>
    %203 = vector.extract_strided_slice %165 {offsets = [0, 6], sizes = [8, 1], strides = [1, 1]} : vector<8x128xf32> to vector<8x1xf32>
    %c150 = arith.constant 150 : index
    %c0_38 = arith.constant 0 : index
    %204 = vector.load %arg1[%c150, %c0_38] : memref<272x128xf32, #tpu.memory_space<vmem>>, vector<1x128xf32>
    %205 = vector.broadcast %203 : vector<8x1xf32> to vector<8x128xf32>
    %206 = vector.broadcast %204 : vector<1x128xf32> to vector<8x128xf32>
    %207 = arith.mulf %205, %206 : vector<8x128xf32>
    %208 = arith.addf %202, %207 : vector<8x128xf32>
    %209 = vector.extract_strided_slice %165 {offsets = [0, 7], sizes = [8, 1], strides = [1, 1]} : vector<8x128xf32> to vector<8x1xf32>
    %c151 = arith.constant 151 : index
    %c0_39 = arith.constant 0 : index
    %210 = vector.load %arg1[%c151, %c0_39] : memref<272x128xf32, #tpu.memory_space<vmem>>, vector<1x128xf32>
    %211 = vector.broadcast %209 : vector<8x1xf32> to vector<8x128xf32>
    %212 = vector.broadcast %210 : vector<1x128xf32> to vector<8x128xf32>
    %213 = arith.mulf %211, %212 : vector<8x128xf32>
    %214 = arith.addf %208, %213 : vector<8x128xf32>
    %215 = vector.extract_strided_slice %165 {offsets = [0, 8], sizes = [8, 1], strides = [1, 1]} : vector<8x128xf32> to vector<8x1xf32>
    %c152 = arith.constant 152 : index
    %c0_40 = arith.constant 0 : index
    %216 = vector.load %arg1[%c152, %c0_40] : memref<272x128xf32, #tpu.memory_space<vmem>>, vector<1x128xf32>
    %217 = vector.broadcast %215 : vector<8x1xf32> to vector<8x128xf32>
    %218 = vector.broadcast %216 : vector<1x128xf32> to vector<8x128xf32>
    %219 = arith.mulf %217, %218 : vector<8x128xf32>
    %220 = arith.addf %214, %219 : vector<8x128xf32>
    %221 = vector.extract_strided_slice %165 {offsets = [0, 9], sizes = [8, 1], strides = [1, 1]} : vector<8x128xf32> to vector<8x1xf32>
    %c153 = arith.constant 153 : index
    %c0_41 = arith.constant 0 : index
    %222 = vector.load %arg1[%c153, %c0_41] : memref<272x128xf32, #tpu.memory_space<vmem>>, vector<1x128xf32>
    %223 = vector.broadcast %221 : vector<8x1xf32> to vector<8x128xf32>
    %224 = vector.broadcast %222 : vector<1x128xf32> to vector<8x128xf32>
    %225 = arith.mulf %223, %224 : vector<8x128xf32>
    %226 = arith.addf %220, %225 : vector<8x128xf32>
    %227 = vector.extract_strided_slice %165 {offsets = [0, 10], sizes = [8, 1], strides = [1, 1]} : vector<8x128xf32> to vector<8x1xf32>
    %c154 = arith.constant 154 : index
    %c0_42 = arith.constant 0 : index
    %228 = vector.load %arg1[%c154, %c0_42] : memref<272x128xf32, #tpu.memory_space<vmem>>, vector<1x128xf32>
    %229 = vector.broadcast %227 : vector<8x1xf32> to vector<8x128xf32>
    %230 = vector.broadcast %228 : vector<1x128xf32> to vector<8x128xf32>
    %231 = arith.mulf %229, %230 : vector<8x128xf32>
    %232 = arith.addf %226, %231 : vector<8x128xf32>
    %233 = vector.extract_strided_slice %165 {offsets = [0, 11], sizes = [8, 1], strides = [1, 1]} : vector<8x128xf32> to vector<8x1xf32>
    %c155 = arith.constant 155 : index
    %c0_43 = arith.constant 0 : index
    %234 = vector.load %arg1[%c155, %c0_43] : memref<272x128xf32, #tpu.memory_space<vmem>>, vector<1x128xf32>
    %235 = vector.broadcast %233 : vector<8x1xf32> to vector<8x128xf32>
    %236 = vector.broadcast %234 : vector<1x128xf32> to vector<8x128xf32>
    %237 = arith.mulf %235, %236 : vector<8x128xf32>
    %238 = arith.addf %232, %237 : vector<8x128xf32>
    %239 = vector.extract_strided_slice %165 {offsets = [0, 12], sizes = [8, 1], strides = [1, 1]} : vector<8x128xf32> to vector<8x1xf32>
    %c156 = arith.constant 156 : index
    %c0_44 = arith.constant 0 : index
    %240 = vector.load %arg1[%c156, %c0_44] : memref<272x128xf32, #tpu.memory_space<vmem>>, vector<1x128xf32>
    %241 = vector.broadcast %239 : vector<8x1xf32> to vector<8x128xf32>
    %242 = vector.broadcast %240 : vector<1x128xf32> to vector<8x128xf32>
    %243 = arith.mulf %241, %242 : vector<8x128xf32>
    %244 = arith.addf %238, %243 : vector<8x128xf32>
    %245 = vector.extract_strided_slice %165 {offsets = [0, 13], sizes = [8, 1], strides = [1, 1]} : vector<8x128xf32> to vector<8x1xf32>
    %c157 = arith.constant 157 : index
    %c0_45 = arith.constant 0 : index
    %246 = vector.load %arg1[%c157, %c0_45] : memref<272x128xf32, #tpu.memory_space<vmem>>, vector<1x128xf32>
    %247 = vector.broadcast %245 : vector<8x1xf32> to vector<8x128xf32>
    %248 = vector.broadcast %246 : vector<1x128xf32> to vector<8x128xf32>
    %249 = arith.mulf %247, %248 : vector<8x128xf32>
    %250 = arith.addf %244, %249 : vector<8x128xf32>
    %251 = vector.extract_strided_slice %165 {offsets = [0, 14], sizes = [8, 1], strides = [1, 1]} : vector<8x128xf32> to vector<8x1xf32>
    %c158 = arith.constant 158 : index
    %c0_46 = arith.constant 0 : index
    %252 = vector.load %arg1[%c158, %c0_46] : memref<272x128xf32, #tpu.memory_space<vmem>>, vector<1x128xf32>
    %253 = vector.broadcast %251 : vector<8x1xf32> to vector<8x128xf32>
    %254 = vector.broadcast %252 : vector<1x128xf32> to vector<8x128xf32>
    %255 = arith.mulf %253, %254 : vector<8x128xf32>
    %256 = arith.addf %250, %255 : vector<8x128xf32>
    %257 = vector.extract_strided_slice %165 {offsets = [0, 15], sizes = [8, 1], strides = [1, 1]} : vector<8x128xf32> to vector<8x1xf32>
    %c159 = arith.constant 159 : index
    %c0_47 = arith.constant 0 : index
    %258 = vector.load %arg1[%c159, %c0_47] : memref<272x128xf32, #tpu.memory_space<vmem>>, vector<1x128xf32>
    %259 = vector.broadcast %257 : vector<8x1xf32> to vector<8x128xf32>
    %260 = vector.broadcast %258 : vector<1x128xf32> to vector<8x128xf32>
    %261 = arith.mulf %259, %260 : vector<8x128xf32>
    %262 = arith.addf %256, %261 : vector<8x128xf32>
    %263 = vector.extract_strided_slice %165 {offsets = [0, 16], sizes = [8, 1], strides = [1, 1]} : vector<8x128xf32> to vector<8x1xf32>
    %c160 = arith.constant 160 : index
    %c0_48 = arith.constant 0 : index
    %264 = vector.load %arg1[%c160, %c0_48] : memref<272x128xf32, #tpu.memory_space<vmem>>, vector<1x128xf32>
    %265 = vector.broadcast %263 : vector<8x1xf32> to vector<8x128xf32>
    %266 = vector.broadcast %264 : vector<1x128xf32> to vector<8x128xf32>
    %267 = arith.mulf %265, %266 : vector<8x128xf32>
    %268 = arith.addf %262, %267 : vector<8x128xf32>
    %269 = vector.extract_strided_slice %165 {offsets = [0, 17], sizes = [8, 1], strides = [1, 1]} : vector<8x128xf32> to vector<8x1xf32>
    %c161 = arith.constant 161 : index
    %c0_49 = arith.constant 0 : index
    %270 = vector.load %arg1[%c161, %c0_49] : memref<272x128xf32, #tpu.memory_space<vmem>>, vector<1x128xf32>
    %271 = vector.broadcast %269 : vector<8x1xf32> to vector<8x128xf32>
    %272 = vector.broadcast %270 : vector<1x128xf32> to vector<8x128xf32>
    %273 = arith.mulf %271, %272 : vector<8x128xf32>
    %274 = arith.addf %268, %273 : vector<8x128xf32>
    %275 = vector.extract_strided_slice %165 {offsets = [0, 18], sizes = [8, 1], strides = [1, 1]} : vector<8x128xf32> to vector<8x1xf32>
    %c162 = arith.constant 162 : index
    %c0_50 = arith.constant 0 : index
    %276 = vector.load %arg1[%c162, %c0_50] : memref<272x128xf32, #tpu.memory_space<vmem>>, vector<1x128xf32>
    %277 = vector.broadcast %275 : vector<8x1xf32> to vector<8x128xf32>
    %278 = vector.broadcast %276 : vector<1x128xf32> to vector<8x128xf32>
    %279 = arith.mulf %277, %278 : vector<8x128xf32>
    %280 = arith.addf %274, %279 : vector<8x128xf32>
    %281 = vector.extract_strided_slice %165 {offsets = [0, 19], sizes = [8, 1], strides = [1, 1]} : vector<8x128xf32> to vector<8x1xf32>
    %c163 = arith.constant 163 : index
    %c0_51 = arith.constant 0 : index
    %282 = vector.load %arg1[%c163, %c0_51] : memref<272x128xf32, #tpu.memory_space<vmem>>, vector<1x128xf32>
    %283 = vector.broadcast %281 : vector<8x1xf32> to vector<8x128xf32>
    %284 = vector.broadcast %282 : vector<1x128xf32> to vector<8x128xf32>
    %285 = arith.mulf %283, %284 : vector<8x128xf32>
    %286 = arith.addf %280, %285 : vector<8x128xf32>
    %287 = vector.extract_strided_slice %165 {offsets = [0, 20], sizes = [8, 1], strides = [1, 1]} : vector<8x128xf32> to vector<8x1xf32>
    %c164 = arith.constant 164 : index
    %c0_52 = arith.constant 0 : index
    %288 = vector.load %arg1[%c164, %c0_52] : memref<272x128xf32, #tpu.memory_space<vmem>>, vector<1x128xf32>
    %289 = vector.broadcast %287 : vector<8x1xf32> to vector<8x128xf32>
    %290 = vector.broadcast %288 : vector<1x128xf32> to vector<8x128xf32>
    %291 = arith.mulf %289, %290 : vector<8x128xf32>
    %292 = arith.addf %286, %291 : vector<8x128xf32>
    %293 = vector.extract_strided_slice %165 {offsets = [0, 21], sizes = [8, 1], strides = [1, 1]} : vector<8x128xf32> to vector<8x1xf32>
    %c165 = arith.constant 165 : index
    %c0_53 = arith.constant 0 : index
    %294 = vector.load %arg1[%c165, %c0_53] : memref<272x128xf32, #tpu.memory_space<vmem>>, vector<1x128xf32>
    %295 = vector.broadcast %293 : vector<8x1xf32> to vector<8x128xf32>
    %296 = vector.broadcast %294 : vector<1x128xf32> to vector<8x128xf32>
    %297 = arith.mulf %295, %296 : vector<8x128xf32>
    %298 = arith.addf %292, %297 : vector<8x128xf32>
    %299 = vector.extract_strided_slice %165 {offsets = [0, 22], sizes = [8, 1], strides = [1, 1]} : vector<8x128xf32> to vector<8x1xf32>
    %c166 = arith.constant 166 : index
    %c0_54 = arith.constant 0 : index
    %300 = vector.load %arg1[%c166, %c0_54] : memref<272x128xf32, #tpu.memory_space<vmem>>, vector<1x128xf32>
    %301 = vector.broadcast %299 : vector<8x1xf32> to vector<8x128xf32>
    %302 = vector.broadcast %300 : vector<1x128xf32> to vector<8x128xf32>
    %303 = arith.mulf %301, %302 : vector<8x128xf32>
    %304 = arith.addf %298, %303 : vector<8x128xf32>
    %305 = vector.extract_strided_slice %165 {offsets = [0, 23], sizes = [8, 1], strides = [1, 1]} : vector<8x128xf32> to vector<8x1xf32>
    %c167 = arith.constant 167 : index
    %c0_55 = arith.constant 0 : index
    %306 = vector.load %arg1[%c167, %c0_55] : memref<272x128xf32, #tpu.memory_space<vmem>>, vector<1x128xf32>
    %307 = vector.broadcast %305 : vector<8x1xf32> to vector<8x128xf32>
    %308 = vector.broadcast %306 : vector<1x128xf32> to vector<8x128xf32>
    %309 = arith.mulf %307, %308 : vector<8x128xf32>
    %310 = arith.addf %304, %309 : vector<8x128xf32>
    %311 = tpu.iota {dimensions = array<i32: 1>} : vector<1x128xi32>
    %c3_i32 = arith.constant 3 : i32
    %312 = vector.broadcast %c3_i32 : i32 to vector<1x128xi32>
    %313 = arith.cmpi slt, %311, %312 : vector<1x128xi32>
    %cst_56 = arith.constant 0.000000e+00 : f32
    %314 = vector.shape_cast %313 : vector<1x128xi1> to vector<1x128xi1>
    %315 = vector.broadcast %314 : vector<1x128xi1> to vector<8x128xi1>
    %316 = vector.broadcast %cst_56 : f32 to vector<8x128xf32>
    %317 = arith.select %315, %310, %316 : vector<8x128xi1>, vector<8x128xf32>
    %318 = vector.shape_cast %317 : vector<8x128xf32> to vector<1x8x128xf32>
    %cst_57 = arith.constant dense<0.000000e+00> : vector<1xf32>
    %319 = vector.multi_reduction <add>, %318, %cst_57 [1, 2] : vector<1x8x128xf32> to vector<1xf32>
    %320 = vector.shape_cast %319 : vector<1xf32> to vector<1x1x1xf32>
    %321 = vector.extract %320[0, 0, 0] : f32 from vector<1x1x1xf32>
    %cst_58 = arith.constant 0.0416666679 : f32
    %322 = arith.mulf %321, %cst_58 : f32
    %323 = vector.extract_strided_slice %310 {offsets = [0, 3], sizes = [8, 1], strides = [1, 1]} : vector<8x128xf32> to vector<8x1xf32>
    %324 = vector.broadcast %322 : f32 to vector<8x1xf32>
    %325 = arith.subf %323, %324 : vector<8x1xf32>
    %326 = vector.broadcast %325 : vector<8x1xf32> to vector<8x128xf32>
    %327 = arith.addf %310, %326 : vector<8x128xf32>
    %cst_59 = arith.constant 0.000000e+00 : f32
    %328 = vector.shape_cast %313 : vector<1x128xi1> to vector<1x128xi1>
    %329 = vector.broadcast %328 : vector<1x128xi1> to vector<8x128xi1>
    %330 = vector.broadcast %cst_59 : f32 to vector<8x128xf32>
    %331 = arith.select %329, %327, %330 : vector<8x128xi1>, vector<8x128xf32>
    %c0_60 = arith.constant 0 : index
    %c0_61 = arith.constant 0 : index
    %332 = vector.load %arg2[%c0_60, %c0_61] : memref<8x128xf32, #tpu.memory_space<vmem>>, vector<8x128xf32>
    tpu.vector_store %arg2[%c0_60, %c0_61], %331 {strides = array<i32>} : memref<8x128xf32, #tpu.memory_space<vmem>>, vector<8x128xf32>,
    return
  }
}

</mosaic_0001>

<bundles_post_ra>
// kernel: net_forward_padded.1
= control target key start
LH: loop header
LB: loop body
LE: loop exit
PB: predicated region body
PF: predicated region fallthrough
CT: control target
= control target key end

     0   :  { %7 = vsyncpa [#allocation3], 0  ;;  %s946_s0 = inlined_call_operand.vmem [shape: f32[8,2], index: 0, kind: input, shape index: {}]   ;;  %s947_s1 = inlined_call_operand.hbm [shape: f32[272,128], index: 1, kind: input, shape index: {}]   ;;  %s948_s2 = inlined_call_operand.hbm [shape: f32[8,128], index: 2, kind: output, shape index: {}]  }
   0x1   :  { %8 = vsyncpa [#allocation4], 0  ;;  %s817_s9 = smov [#allocation2]  }
   0x2   :  { %s16_s10 = sshll.u32 %s817_s9, 4  ;;  %s17_s10 = int_to_ptr.vmem [resolvable:$true] %s16_s10 }
   0x3   :  { %s781_s11 = scalar_lea.vmem %s17_s10, 4352  ;;  %p786_p1 = scmp.lt.s32.totalorder %s17_s10, %s17_s10 }
   0x4   :  { %p782_p0 = scmp.ne.s32.totalorder %s17_s10, %s781_s11  ;;  %p787_p2 = scmp.lt.s32.totalorder %s781_s11, %s781_s11 }
   0x6   :  { %p788_p3 = por %p787_p2, %p786_p1 }
   0x8   :  { %p789_p4 = pnand %p788_p3, %p782_p0 }
   0xa   :  { %792 = shalt.err (!%p789_p4)
}
   0xb   :  { %s818_s12 = smov 128   ;;  %s819_s13 = smov 8  }
   0xc   :  { %22 = dma.hbm_to_vmem [thread:$0]  %s947_s1, 4352, %s17_s10, [#allocation3], %s818_s12, %s818_s12, %s819_s13  }
   0xd   :  { %813 = dma.done.wait [#allocation3], 4352  }
   0xe   :  { %814 = vsyncadd [#allocation3], 4294962944  ;;  %v820_v0 = vmov 0   ;;  %v26_v1 = vld [vmem:[%s946_s0] sm:$0xff]  ;;  %v821_v2 = vmov 1   ;;  %v822_v3 = vmov 3  }
   0xf   :  { %721 = vset.pattern.permute.xlu0 %v820_v0  ;;  %723 = vset.pattern.permute.xlu1 %v820_v0  ;;  %v638_v4 = vld [vmem:[#allocation2] ss:$0 sm:$0xff]  ;;  %v639_v7 = vld [vmem:[#allocation2 + $0x8] ss:$0 sm:$0xff]  ;;  %v640_v8 = vld [vmem:[#allocation2 + $0x1] ss:$0 sm:$0xff] }
  0x10   :  { %33 = vperm.xlu0 %721, %v26_v1   ;;  %v823_v14 = vmov 6   ;;  %v824_v15 = vmov 9   ;;  %v825_v16 = vmov 2   ;;  %v826_v17 = vmov 12   ;;  %v641_v36 = vld [vmem:[#allocation2 + $0x10] ss:$0 sm:$0xff] }
  0x11   :  { %v827_v18 = vmov 4   ;;  %v828_v19 = vmov 15   ;;  %v829_v20 = vmov 5   ;;  %v830_v21 = vmov 18   ;;  %v643_v37 = vld [vmem:[#allocation2 + $0x11] ss:$0 sm:$0xff] }
  0x12   :  { %v831_v22 = vmov 7   ;;  %v832_v23 = vmov 21   ;;  %v833_v24 = vmov 8   ;;  %v834_v25 = vmov 10   ;;  %v642_v40 = vld [vmem:[#allocation2 + $0x9] ss:$0 sm:$0xff] }
  0x13   :  { %v835_v26 = vmov 11   ;;  %v836_v27 = vmov 13   ;;  %v837_v28 = vmov 14   ;;  %v838_v29 = vmov 16   ;;  %v644_v42 = vld [vmem:[#allocation2 + $0x12] ss:$0 sm:$0xff] }
  0x14   :  { %722 = vset.pattern.permute.xlu0 %v821_v2  ;;  %v839_v30 = vmov 17   ;;  %v840_v31 = vmov 19   ;;  %v841_v32 = vmov 20   ;;  %v842_v33 = vmov 22   ;;  %v645_v47 = vld [vmem:[#allocation2 + $0x13] ss:$0 sm:$0xff] }
  0x15   :  { %48 = vperm.xlu0 %722, %v26_v1   ;;  %v843_v34 = vmov 23   ;;  %v646_v50 = vld [vmem:[#allocation2 + $0x14] ss:$0 sm:$0xff]  ;;  %v647_v55 = vld [vmem:[#allocation2 + $0x15] ss:$0 sm:$0xff]  ;;  %s844_s18 = smov [#allocation5]  }
  0x16   :  { %v648_v59 = vld [vmem:[#allocation2 + $0x16] ss:$0 sm:$0xff]  ;;  %v649_v62 = vld [vmem:[#allocation2 + $0x17] ss:$0 sm:$0xff]  ;;  %s629_s19 = sshll.u32 %s844_s18, 4  ;;  %s630_s19 = int_to_ptr.vmem [resolvable:$true] %s629_s19 }
  0x17   :  { %s793_s20 = scalar_lea.vmem %s630_s19, 128  ;;  %p798_p6 = scmp.lt.s32.totalorder %s630_s19, %s630_s19 }
  0x18   :  { %p794_p5 = scmp.ne.s32.totalorder %s630_s19, %s793_s20  ;;  %p799_p7 = scmp.lt.s32.totalorder %s793_s20, %s793_s20 }
  0x19   :  { %726 = vset.pattern.permute.xlu0 %v822_v3 }
  0x1a   :  { %p800_p8 = por %p799_p7, %p798_p6 }
  0x1c   :  { %p801_p9 = pnand %p800_p8, %p794_p5 }
  0x8b   :  { %v34_v5 = vpop.permute.xlu0 %33 }
  0x8c   :  { %v40_v6 = vmul.f32 %v638_v4, %v34_v5  ;;  %v650_v4 = vld [vmem:[#allocation2 + $0x18] ss:$0 sm:$0xff] }
  0x8e   :  { %v45_v10 = vadd.f32 %v639_v7, %v40_v6 }
  0x90   :  { %v49_v9 = vpop.permute.xlu0 %48 }
  0x91   :  { %v55_v11 = vmul.f32 %v640_v8, %v49_v9  ;;  %v651_v8 = vld [vmem:[#allocation2 + $0x19] ss:$0 sm:$0xff] }
  0x93   :  { %v56_v12 = vadd.f32 %v55_v11, %v45_v10  ;;  %v652_v11 = vld [vmem:[#allocation2 + $0x1a] ss:$0 sm:$0xff] }
  0x95   :  { %v868_v13 = vmax.f32 %v56_v12, 0.0 }
  0x97   :  { %98 = vperm.xlu0 %726, %v868_v13   ;;  %61 = vperm.xlu1 %723, %v868_v13  }
  0x9b   :  { %729 = vset.pattern.permute.xlu0 %v823_v14  ;;  %724 = vset.pattern.permute.xlu1 %v821_v2 }
  0x9c   :  { %131 = vperm.xlu0 %729, %v868_v13   ;;  %76 = vperm.xlu1 %724, %v868_v13  }
  0xa0   :  { %732 = vset.pattern.permute.xlu0 %v824_v15  ;;  %725 = vset.pattern.permute.xlu1 %v825_v16 }
  0xa1   :  { %164 = vperm.xlu0 %732, %v868_v13   ;;  %87 = vperm.xlu1 %725, %v868_v13  }
  0xa5   :  { %735 = vset.pattern.permute.xlu0 %v826_v17  ;;  %727 = vset.pattern.permute.xlu1 %v827_v18 }
  0xa6   :  { %197 = vperm.xlu0 %735, %v868_v13   ;;  %109 = vperm.xlu1 %727, %v868_v13  }
  0xaa   :  { %738 = vset.pattern.permute.xlu0 %v828_v19  ;;  %728 = vset.pattern.permute.xlu1 %v829_v20 }
  0xab   :  { %230 = vperm.xlu0 %738, %v868_v13   ;;  %120 = vperm.xlu1 %728, %v868_v13  }
  0xaf   :  { %741 = vset.pattern.permute.xlu0 %v830_v21  ;;  %730 = vset.pattern.permute.xlu1 %v831_v22 }
  0xb0   :  { %263 = vperm.xlu0 %741, %v868_v13   ;;  %142 = vperm.xlu1 %730, %v868_v13  }
  0xb4   :  { %744 = vset.pattern.permute.xlu0 %v832_v23  ;;  %731 = vset.pattern.permute.xlu1 %v833_v24 }
  0xb5   :  { %296 = vperm.xlu0 %744, %v868_v13   ;;  %153 = vperm.xlu1 %731, %v868_v13  }
  0xb9   :  { %733 = vset.pattern.permute.xlu1 %v834_v25  ;;  %747 = vset.pattern.permute.xlu0 %v820_v0 }
  0xba   :  { %175 = vperm.xlu1 %733, %v868_v13  }
  0xbe   :  { %734 = vset.pattern.permute.xlu1 %v835_v26 }
  0xbf   :  { %186 = vperm.xlu1 %734, %v868_v13  }
  0xc3   :  { %736 = vset.pattern.permute.xlu1 %v836_v27 }
  0xc4   :  { %208 = vperm.xlu1 %736, %v868_v13  }
  0xc8   :  { %737 = vset.pattern.permute.xlu1 %v837_v28 }
  0xc9   :  { %219 = vperm.xlu1 %737, %v868_v13  }
  0xcd   :  { %739 = vset.pattern.permute.xlu1 %v838_v29 }
  0xce   :  { %241 = vperm.xlu1 %739, %v868_v13  }
  0xd2   :  { %740 = vset.pattern.permute.xlu1 %v839_v30 }
  0xd3   :  { %252 = vperm.xlu1 %740, %v868_v13  }
  0xd7   :  { %742 = vset.pattern.permute.xlu1 %v840_v31 }
  0xd8   :  { %274 = vperm.xlu1 %742, %v868_v13  }
  0xdc   :  { %743 = vset.pattern.permute.xlu1 %v841_v32 }
  0xdd   :  { %285 = vperm.xlu1 %743, %v868_v13  }
  0xe1   :  { %745 = vset.pattern.permute.xlu1 %v842_v33 }
  0xe2   :  { %307 = vperm.xlu1 %745, %v868_v13  }
  0xe6   :  { %746 = vset.pattern.permute.xlu1 %v843_v34 }
  0xe7   :  { %318 = vperm.xlu1 %746, %v868_v13  }
  0xeb   :  { %748 = vset.pattern.permute.xlu1 %v821_v2 }
 0x112   :  { %v62_v35 = vpop.permute.xlu1 %61  ;;  %v99_v48 = vpop.permute.xlu0 %98 }
 0x113   :  { %v68_v38 = vmul.f32 %v641_v36, %v62_v35  ;;  %v105_v51 = vmul.f32 %v645_v47, %v99_v48 }
 0x115   :  { %v73_v43 = vadd.f32 %v642_v40, %v68_v38 }
 0x117   :  { %v77_v39 = vpop.permute.xlu1 %76  ;;  %v132_v60 = vpop.permute.xlu0 %131 }
 0x118   :  { %v83_v41 = vmul.f32 %v643_v37, %v77_v39  ;;  %v138_v63 = vmul.f32 %v648_v59, %v132_v60  ;;  %v653_v37 = vld [vmem:[#allocation2 + $0x1b] ss:$0 sm:$0xff] }
 0x11a   :  { %v84_v45 = vadd.f32 %v83_v41, %v73_v43  ;;  %v654_v41 = vld [vmem:[#allocation2 + $0x1c] ss:$0 sm:$0xff] }
 0x11c   :  { %v88_v44 = vpop.permute.xlu1 %87  ;;  %v165_v9 = vpop.permute.xlu0 %164 }
 0x11d   :  { %v94_v46 = vmul.f32 %v644_v42, %v88_v44  ;;  %v171_v12 = vmul.f32 %v651_v8, %v165_v9  ;;  %v655_v44 = vld [vmem:[#allocation2 + $0x1d] ss:$0 sm:$0xff] }
 0x11f   :  { %v95_v49 = vadd.f32 %v94_v46, %v84_v45 }
 0x121   :  { %v110_v52 = vpop.permute.xlu1 %109  ;;  %v106_v53 = vadd.f32 %v105_v51, %v95_v49  ;;  %v198_v42 = vpop.permute.xlu0 %197  ;;  %v656_v49 = vld [vmem:[#allocation2 + $0x1e] ss:$0 sm:$0xff] }
 0x122   :  { %v116_v54 = vmul.f32 %v646_v50, %v110_v52  ;;  %v204_v45 = vmul.f32 %v654_v41, %v198_v42 }
 0x124   :  { %v117_v57 = vadd.f32 %v116_v54, %v106_v53  ;;  %v657_v53 = vld [vmem:[#allocation2 + $0x1f] ss:$0 sm:$0xff] }
 0x126   :  { %v121_v56 = vpop.permute.xlu1 %120  ;;  %v231_v54 = vpop.permute.xlu0 %230 }
 0x127   :  { %v127_v58 = vmul.f32 %v647_v55, %v121_v56  ;;  %v658_v56 = vld [vmem:[#allocation2 + $0x20] ss:$0 sm:$0xff] }
 0x129   :  { %v128_v61 = vadd.f32 %v127_v58, %v117_v57  ;;  %v237_v57 = vmul.f32 %v657_v53, %v231_v54  ;;  %v674_v54 = vld [vmem:[#allocation2 + $0x97] ss:$0 sm:$0xff] }
 0x12b   :  { %v143_v0 = vpop.permute.xlu1 %142  ;;  %v139_v1 = vadd.f32 %v138_v63, %v128_v61  ;;  %v659_v61 = vld [vmem:[#allocation2 + $0x21] ss:$0 sm:$0xff] }
 0x12c   :  { %v149_v2 = vmul.f32 %v649_v62, %v143_v0 }
 0x12e   :  { %v150_v6 = vadd.f32 %v149_v2, %v139_v1  ;;  %v660_v1 = vld [vmem:[#allocation2 + $0x22] ss:$0 sm:$0xff]  ;;  %v264_v2 = vpop.permute.xlu0 %263 }
 0x130   :  { %v154_v5 = vpop.permute.xlu1 %153 }
 0x131   :  { %v160_v7 = vmul.f32 %v650_v4, %v154_v5  ;;  %v661_v5 = vld [vmem:[#allocation2 + $0x23] ss:$0 sm:$0xff] }
 0x133   :  { %v161_v10 = vadd.f32 %v160_v7, %v150_v6  ;;  %v270_v6 = vmul.f32 %v660_v1, %v264_v2  ;;  %v677_v2 = vld [vmem:[#allocation2 + $0x9a] ss:$0 sm:$0xff] }
 0x135   :  { %v176_v13 = vpop.permute.xlu1 %175  ;;  %v172_v35 = vadd.f32 %v171_v12, %v161_v10  ;;  %v662_v10 = vld [vmem:[#allocation2 + $0x24] ss:$0 sm:$0xff] }
 0x136   :  { %v182_v36 = vmul.f32 %v652_v11, %v176_v13 }
 0x138   :  { %v183_v39 = vadd.f32 %v182_v36, %v172_v35  ;;  %v663_v35 = vld [vmem:[#allocation2 + $0x25] ss:$0 sm:$0xff]  ;;  %v297_v36 = vpop.permute.xlu0 %296 }
 0x13a   :  { %v187_v38 = vpop.permute.xlu1 %186 }
 0x13b   :  { %v193_v40 = vmul.f32 %v653_v37, %v187_v38  ;;  %v664_v38 = vld [vmem:[#allocation2 + $0x26] ss:$0 sm:$0xff] }
 0x13d   :  { %v194_v43 = vadd.f32 %v193_v40, %v183_v39  ;;  %v303_v39 = vmul.f32 %v663_v35, %v297_v36  ;;  %v680_v36 = vld [vmem:[#allocation2 + $0x9d] ss:$0 sm:$0xff] }
 0x13f   :  { %v209_v46 = vpop.permute.xlu1 %208  ;;  %v205_v47 = vadd.f32 %v204_v45, %v194_v43  ;;  %v665_v43 = vld [vmem:[#allocation2 + $0x27] ss:$0 sm:$0xff] }
 0x140   :  { %v215_v48 = vmul.f32 %v655_v44, %v209_v46 }
 0x142   :  { %v216_v51 = vadd.f32 %v215_v48, %v205_v47 }
 0x144   :  { %v220_v50 = vpop.permute.xlu1 %219 }
 0x145   :  { %v226_v52 = vmul.f32 %v656_v49, %v220_v50 }
 0x147   :  { %v227_v55 = vadd.f32 %v226_v52, %v216_v51  ;;  %v673_v51 = vld [vmem:[#allocation2 + $0x96] ss:$0 sm:$0xff] }
 0x149   :  { %v242_v58 = vpop.permute.xlu1 %241  ;;  %v238_v59 = vadd.f32 %v237_v57, %v227_v55 }
 0x14a   :  { %v248_v60 = vmul.f32 %v658_v56, %v242_v58 }
 0x14c   :  { %v249_v63 = vadd.f32 %v248_v60, %v238_v59  ;;  %v675_v59 = vld [vmem:[#allocation2 + $0x98] ss:$0 sm:$0xff] }
 0x14e   :  { %v253_v62 = vpop.permute.xlu1 %252 }
 0x14f   :  { %v259_v0 = vmul.f32 %v659_v61, %v253_v62 }
 0x151   :  { %v260_v4 = vadd.f32 %v259_v0, %v249_v63  ;;  %v676_v63 = vld [vmem:[#allocation2 + $0x99] ss:$0 sm:$0xff] }
 0x153   :  { %v275_v7 = vpop.permute.xlu1 %274  ;;  %v271_v8 = vadd.f32 %v270_v6, %v260_v4 }
 0x154   :  { %v281_v9 = vmul.f32 %v661_v5, %v275_v7 }
 0x156   :  { %v282_v12 = vadd.f32 %v281_v9, %v271_v8  ;;  %v678_v8 = vld [vmem:[#allocation2 + $0x9b] ss:$0 sm:$0xff] }
 0x158   :  { %v286_v11 = vpop.permute.xlu1 %285 }
 0x159   :  { %v292_v13 = vmul.f32 %v662_v10, %v286_v11 }
 0x15b   :  { %v293_v37 = vadd.f32 %v292_v13, %v282_v12  ;;  %v679_v12 = vld [vmem:[#allocation2 + $0x9c] ss:$0 sm:$0xff] }
 0x15d   :  { %v308_v40 = vpop.permute.xlu1 %307  ;;  %v304_v41 = vadd.f32 %v303_v39, %v293_v37 }
 0x15e   :  { %v314_v42 = vmul.f32 %v664_v38, %v308_v40 }
 0x160   :  { %v315_v45 = vadd.f32 %v314_v42, %v304_v41  ;;  %v681_v41 = vld [vmem:[#allocation2 + $0x9e] ss:$0 sm:$0xff] }
 0x162   :  { %v319_v44 = vpop.permute.xlu1 %318 }
 0x163   :  { %v325_v46 = vmul.f32 %v665_v43, %v319_v44 }
 0x165   :  { %v326_v47 = vadd.f32 %v325_v46, %v315_v45  ;;  %v682_v45 = vld [vmem:[#allocation2 + $0x9f] ss:$0 sm:$0xff] }
 0x167   :  { %v327_v48 = vmax.f32 %v326_v47, 0.0 }
 0x169   :  { %346 = vperm.xlu1 %748, %v327_v48   ;;  %331 = vperm.xlu0 %747, %v327_v48  }
 0x16d   :  { %749 = vset.pattern.permute.xlu1 %v825_v16  ;;  %750 = vset.pattern.permute.xlu0 %v822_v3 }
 0x16e   :  { %357 = vperm.xlu1 %749, %v327_v48   ;;  %368 = vperm.xlu0 %750, %v327_v48  }
 0x172   :  { %751 = vset.pattern.permute.xlu1 %v827_v18  ;;  %753 = vset.pattern.permute.xlu0 %v823_v14  ;;  %v666_v14 = vld [vmem:[#allocation2 + $0x90] ss:$0 sm:$0xff] }
 0x173   :  { %379 = vperm.xlu1 %751, %v327_v48   ;;  %401 = vperm.xlu0 %753, %v327_v48  }
 0x177   :  { %752 = vset.pattern.permute.xlu1 %v829_v20  ;;  %756 = vset.pattern.permute.xlu0 %v824_v15  ;;  %v668_v15 = vld [vmem:[#allocation2 + $0x91] ss:$0 sm:$0xff] }
 0x178   :  { %390 = vperm.xlu1 %752, %v327_v48   ;;  %434 = vperm.xlu0 %756, %v327_v48  }
 0x17c   :  { %754 = vset.pattern.permute.xlu1 %v831_v22  ;;  %759 = vset.pattern.permute.xlu0 %v826_v17  ;;  %v667_v17 = vld [vmem:[#allocation2 + $0xa] ss:$0 sm:$0xff]  ;;  %v669_v22 = vld [vmem:[#allocation2 + $0x92] ss:$0 sm:$0xff] }
 0x17d   :  { %412 = vperm.xlu1 %754, %v327_v48   ;;  %467 = vperm.xlu0 %759, %v327_v48  }
 0x181   :  { %755 = vset.pattern.permute.xlu1 %v833_v24  ;;  %762 = vset.pattern.permute.xlu0 %v828_v19 }
 0x182   :  { %423 = vperm.xlu1 %755, %v327_v48   ;;  %500 = vperm.xlu0 %762, %v327_v48  }
 0x186   :  { %757 = vset.pattern.permute.xlu1 %v834_v25  ;;  %765 = vset.pattern.permute.xlu0 %v830_v21 }
 0x187   :  { %445 = vperm.xlu1 %757, %v327_v48   ;;  %533 = vperm.xlu0 %765, %v327_v48  }
 0x18b   :  { %758 = vset.pattern.permute.xlu1 %v835_v26  ;;  %768 = vset.pattern.permute.xlu0 %v832_v23  ;;  %v670_v26 = vld [vmem:[#allocation2 + $0x93] ss:$0 sm:$0xff] }
 0x18c   :  { %456 = vperm.xlu1 %758, %v327_v48   ;;  %566 = vperm.xlu0 %768, %v327_v48  }
 0x190   :  { %760 = vset.pattern.permute.xlu1 %v836_v27  ;;  %772 = vset.pattern.permute.xlu0 %v822_v3 }
 0x191   :  { %478 = vperm.xlu1 %760, %v327_v48  }
 0x195   :  { %761 = vset.pattern.permute.xlu1 %v837_v28 }
 0x196   :  { %489 = vperm.xlu1 %761, %v327_v48  }
 0x19a   :  { %763 = vset.pattern.permute.xlu1 %v838_v29  ;;  %v671_v29 = vld [vmem:[#allocation2 + $0x94] ss:$0 sm:$0xff] }
 0x19b   :  { %511 = vperm.xlu1 %763, %v327_v48  }
 0x19f   :  { %764 = vset.pattern.permute.xlu1 %v839_v30 }
 0x1a0   :  { %522 = vperm.xlu1 %764, %v327_v48  }
 0x1a4   :  { %766 = vset.pattern.permute.xlu1 %v840_v31 }
 0x1a5   :  { %544 = vperm.xlu1 %766, %v327_v48  }
 0x1a9   :  { %767 = vset.pattern.permute.xlu1 %v841_v32 }
 0x1aa   :  { %555 = vperm.xlu1 %767, %v327_v48  }
 0x1ae   :  { %769 = vset.pattern.permute.xlu1 %v842_v33  ;;  %v672_v33 = vld [vmem:[#allocation2 + $0x95] ss:$0 sm:$0xff] }
 0x1af   :  { %577 = vperm.xlu1 %769, %v327_v48  }
 0x1b3   :  { %770 = vset.pattern.permute.xlu1 %v843_v34 }
 0x1b4   :  { %588 = vperm.xlu1 %770, %v327_v48   ;;  %v683_v48 = vld [vmem:[#allocation2 + $0xa0] ss:$0 sm:$0xff] }
 0x1b8   :  { %771 = vset.pattern.permute.xlu1 %v822_v3 }
 0x1e4   :  { %v347_v16 = vpop.permute.xlu1 %346  ;;  %v332_v18 = vpop.permute.xlu0 %331 }
 0x1e5   :  { %v338_v19 = vmul.f32 %v666_v14, %v332_v18  ;;  %v353_v20 = vmul.f32 %v668_v15, %v347_v16  ;;  %v684_v18 = vld [vmem:[#allocation2 + $0xa1] ss:$0 sm:$0xff] }
 0x1e7   :  { %v343_v21 = vadd.f32 %v667_v17, %v338_v19 }
 0x1e9   :  { %v358_v23 = vpop.permute.xlu1 %357  ;;  %v354_v24 = vadd.f32 %v353_v20, %v343_v21  ;;  %v369_v27 = vpop.permute.xlu0 %368 }
 0x1ea   :  { %v364_v25 = vmul.f32 %v669_v22, %v358_v23  ;;  %v375_v30 = vmul.f32 %v670_v26, %v369_v27  ;;  %v685_v22 = vld [vmem:[#allocation2 + $0xa2] ss:$0 sm:$0xff] }
 0x1ec   :  { %v365_v28 = vadd.f32 %v364_v25, %v354_v24  ;;  %v686_v25 = vld [vmem:[#allocation2 + $0xa3] ss:$0 sm:$0xff] }
 0x1ee   :  { %v380_v31 = vpop.permute.xlu1 %379  ;;  %v376_v32 = vadd.f32 %v375_v30, %v365_v28  ;;  %v402_v52 = vpop.permute.xlu0 %401  ;;  %v687_v30 = vld [vmem:[#allocation2 + $0xa4] ss:$0 sm:$0xff] }
 0x1ef   :  { %v386_v3 = vmul.f32 %v671_v29, %v380_v31  ;;  %v408_v55 = vmul.f32 %v673_v51, %v402_v52  ;;  %v597_v51 = vlaneseq }
 0x1f1   :  { %v387_v49 = vadd.f32 %v386_v3, %v376_v32 }
 0x1f3   :  { %v391_v34 = vpop.permute.xlu1 %390  ;;  %v435_v0 = vpop.permute.xlu0 %434 }
 0x1f4   :  { %v397_v50 = vmul.f32 %v672_v33, %v391_v34  ;;  %v441_v4 = vmul.f32 %v676_v63, %v435_v0  ;;  %v688_v33 = vld [vmem:[#allocation2 + $0xa5] ss:$0 sm:$0xff] }
 0x1f6   :  { %v398_v53 = vadd.f32 %v397_v50, %v387_v49  ;;  %v689_v50 = vld [vmem:[#allocation2 + $0xa6] ss:$0 sm:$0xff] }
 0x1f8   :  { %v413_v56 = vpop.permute.xlu1 %412  ;;  %v409_v57 = vadd.f32 %v408_v55, %v398_v53  ;;  %v468_v13 = vpop.permute.xlu0 %467 }
 0x1f9   :  { %v419_v58 = vmul.f32 %v674_v54, %v413_v56  ;;  %v474_v37 = vmul.f32 %v679_v12, %v468_v13  ;;  %v690_v56 = vld [vmem:[#allocation2 + $0xa7] ss:$0 sm:$0xff] }
 0x1fb   :  { %v420_v61 = vadd.f32 %v419_v58, %v409_v57  ;;  %v598_v57 = vand.u32 127, %v597_v51 }
 0x1fd   :  { %v424_v60 = vpop.permute.xlu1 %423  ;;  %v501_v46 = vpop.permute.xlu0 %500  ;;  %vm599_vm0 = vcmp.lt.s32.totalorder %v598_v57, 3 }
 0x1fe   :  { %v430_v62 = vmul.f32 %v675_v59, %v424_v60  ;;  %v507_v14 = vmul.f32 %v682_v45, %v501_v46 }
 0x200   :  { %v431_v1 = vadd.f32 %v430_v62, %v420_v61 }
 0x202   :  { %v446_v5 = vpop.permute.xlu1 %445  ;;  %v442_v6 = vadd.f32 %v441_v4, %v431_v1  ;;  %v534_v23 = vpop.permute.xlu0 %533 }
 0x203   :  { %v452_v7 = vmul.f32 %v677_v2, %v446_v5  ;;  %v540_v26 = vmul.f32 %v685_v22, %v534_v23 }
 0x205   :  { %v453_v10 = vadd.f32 %v452_v7, %v442_v6 }
 0x207   :  { %v457_v9 = vpop.permute.xlu1 %456  ;;  %v567_v34 = vpop.permute.xlu0 %566 }
 0x208   :  { %v463_v11 = vmul.f32 %v678_v8, %v457_v9  ;;  %v573_v52 = vmul.f32 %v688_v33, %v567_v34 }
 0x20a   :  { %v464_v35 = vadd.f32 %v463_v11, %v453_v10 }
 0x20c   :  { %v479_v38 = vpop.permute.xlu1 %478  ;;  %v475_v39 = vadd.f32 %v474_v37, %v464_v35 }
 0x20d   :  { %v485_v40 = vmul.f32 %v680_v36, %v479_v38 }
 0x20f   :  { %v486_v43 = vadd.f32 %v485_v40, %v475_v39 }
 0x211   :  { %v490_v42 = vpop.permute.xlu1 %489 }
 0x212   :  { %v496_v44 = vmul.f32 %v681_v41, %v490_v42 }
 0x214   :  { %v497_v47 = vadd.f32 %v496_v44, %v486_v43 }
 0x216   :  { %v512_v15 = vpop.permute.xlu1 %511  ;;  %v508_v16 = vadd.f32 %v507_v14, %v497_v47 }
 0x217   :  { %v518_v17 = vmul.f32 %v683_v48, %v512_v15 }
 0x219   :  { %v519_v20 = vadd.f32 %v518_v17, %v508_v16 }
 0x21b   :  { %v523_v19 = vpop.permute.xlu1 %522 }
 0x21c   :  { %v529_v21 = vmul.f32 %v684_v18, %v523_v19 }
 0x21e   :  { %v530_v24 = vadd.f32 %v529_v21, %v519_v20 }
 0x220   :  { %v545_v27 = vpop.permute.xlu1 %544  ;;  %v541_v28 = vadd.f32 %v540_v26, %v530_v24 }
 0x221   :  { %v551_v29 = vmul.f32 %v686_v25, %v545_v27 }
 0x223   :  { %v552_v32 = vadd.f32 %v551_v29, %v541_v28 }
 0x225   :  { %v556_v31 = vpop.permute.xlu1 %555 }
 0x226   :  { %v562_v3 = vmul.f32 %v687_v30, %v556_v31 }
 0x228   :  { %v563_v49 = vadd.f32 %v562_v3, %v552_v32 }
 0x22a   :  { %v578_v53 = vpop.permute.xlu1 %577  ;;  %v574_v54 = vadd.f32 %v573_v52, %v563_v49 }
 0x22b   :  { %v584_v55 = vmul.f32 %v689_v50, %v578_v53 }
 0x22d   :  { %v585_v59 = vadd.f32 %v584_v55, %v574_v54 }
 0x22f   :  { %v589_v58 = vpop.permute.xlu1 %588 }
 0x230   :  { %v595_v60 = vmul.f32 %v690_v56, %v589_v58 }
 0x232   :  { %v596_v61 = vadd.f32 %v595_v60, %v585_v59 }
 0x234   :  { %v602_v62 = vsel %vm599_vm0, %v596_v61, 0.0 }
 0x235   :  { %603 = vadd.xlane.f32.xlu0 %v602_v62 }
 0x2be   :  { %v604_v63 = vpop.xlane.xlu0 %603 }
 0x2bf   :  { %v605_v0 = vrot.slane %v604_v63, 4 }
 0x2c1   :  { %v606_v1 = vadd.f32 %v605_v0, %v604_v63 }
 0x2c3   :  { %v607_v2 = vrot.slane %v606_v1, 2 }
 0x2c5   :  { %v608_v4 = vadd.f32 %v607_v2, %v606_v1 }
 0x2c7   :  { %v609_v5 = vrot.slane %v608_v4, 1 }
 0x2c9   :  { %v610_v6 = vadd.f32 %v609_v5, %v608_v4 }
 0x2cb   :  { %691 = vpush %v610_v6 }
 0x2fc   :  { %s692_s0 = spop %691 }
 0x2fd   :  { %s612_s1 = smul.f32 0.041666668, %s692_s0 }
 0x2ff   :  { %v613_v7 = vstv %s612_s1 }
 0x300   :  { %v614_v8 = vsub.f32 %v596_v61, %v613_v7 }
 0x302   :  { %617 = vperm.xlu1 %771, %v614_v8  }
 0x37d   :  { %v618_v9 = vpop.permute.xlu1 %617 }
 0x37e   :  { %v620_v10 = vadd.f32 %v618_v9, %v596_v61 }
 0x380   :  { %v621_v11 = vsel %vm599_vm0, %v620_v10, 0.0 }
 0x381   :  { %622 = vst [vmem:[#allocation5] sm:$0xff] %v621_v11 }
 0x382   :  { %804 = shalt.err (!%p801_p9)
}
 0x383   :  { %632 = dma.vmem_to_hbm [thread:$0]  %s630_s19, 128, %s948_s2, [#allocation4]  }
 0x384   :  { %815 = dma.done.wait [#allocation4], 128  }
 0x385   :  { %816 = vsyncadd [#allocation4], 4294967168 }
 0x386   :  { %636 = vsyncpa [#allocation3], 1 }
 0x387   :  { %637 = vsyncpa [#allocation4], 1 }

</bundles_post_ra>
